<compile_context>
chip_gen: v7x
topology: tpu7x:2x2x1
jax: 0.10.0
libtpu: 0.0.40
codegen_flags: <defaults>
</compile_context>

<pallas_src>
import math
import numpy as np
import jax
import jax.numpy as jnp
from jax import lax
from jax.experimental import pallas as pl
from jax.experimental.pallas import tpu as pltpu

BN_EPS = 1e-5
LEAKY_SLOPE = 0.01

# shift enumeration shared by the weight packer and the kernel (order matters)
_SHIFTS = [(dr, dc) for dr in (-1, 0, 1) for dc in (-1, 0, 1)]


# ----------------------------------------------------------------------------
# HGNN kernel 1: attention scores  attn[b] (L, N) = ReLU(text @ Wf + bf) @ vis[b]^T
# (1x1-conv emb + BN + ReLU + 1/sqrt(C) folded into Wf/bf at trace time)
# ----------------------------------------------------------------------------
def _make_attn_kernel(B, L):
    def kernel(text_ref, vis_ref, we_ref, b1_ref, o_ref):
        te = jnp.dot(text_ref[...], we_ref[...], preferred_element_type=jnp.float32)
        te = jnp.maximum(te + b1_ref[...], 0.0).astype(jnp.bfloat16)      # (B*L, C)
        for b in range(B):                                                # static, small B
            o_ref[b] = lax.dot_general(
                te[b * L:(b + 1) * L], vis_ref[b].astype(jnp.bfloat16),
                (((1,), (1,)), ((), ())), preferred_element_type=jnp.float32)
    return kernel


# ----------------------------------------------------------------------------
# HGNN kernel 2: softmax over N, threshold top-k mask, Linear(text), masked matmul,
# eval BN (scale folded into the weights), ReLU, residual.  Output (B, C, N).
# ----------------------------------------------------------------------------
def _make_hgnn_out_kernel(B, L):
    def kernel(attn_ref, imgT_ref, text_ref, thr_ref, wo_ref, bo_ref, b2_ref, o_ref):
        t_out = jnp.dot(text_ref[...], wo_ref[...],
                        preferred_element_type=jnp.float32) + bo_ref[...]  # (B*L, C)
        for b in range(B):
            a = attn_ref[b]                                                # (L, N)
            mx = jnp.max(a, axis=-1, keepdims=True)
            e = jnp.exp(a - mx)
            p = e / jnp.sum(e, axis=-1, keepdims=True)                     # exact softmax
            p = p * (a >= thr_ref[b]).astype(jnp.float32)                  # top-k via threshold
            tb = t_out[b * L:(b + 1) * L]                                  # (L, C)
            out_t = lax.dot_general(tb.astype(jnp.bfloat16), p.astype(jnp.bfloat16),
                                    (((0,), (0,)), ((), ())),
                                    preferred_element_type=jnp.float32)    # (C, N)
            out_t = out_t + b2_ref[...]
            o_ref[b] = jnp.maximum(out_t, 0.0) + imgT_ref[b]
    return kernel


def hgnn_layer(vis, txt, k_np, p):
    """vis: (B, N, C) channels-last, txt: (B, L, E).  Returns (B, C, N) channels-first."""
    B, N, C = vis.shape
    L, E = txt.shape[1], txt.shape[2]
    inv_sqrt = 1.0 / math.sqrt(C)

    # emb1: Conv1d(E->C,k=1) + eval BN + ReLU + 1/sqrt(C) folded into (Wf, bf)
    s1 = p["emb_bn_gamma"] * lax.rsqrt(p["emb_bn_var"] + BN_EPS)
    b1 = (p["emb_conv_b"] - p["emb_bn_mean"]) * s1 + p["emb_bn_beta"]
    we_f = p["emb_conv_w"].T * (s1 * inv_sqrt)[None, :]                    # (E, C)
    b1_f = (b1 * inv_sqrt).reshape(1, C)

    text2 = txt.reshape(B * L, E)

    attn = pl.pallas_call(
        _make_attn_kernel(B, L),
        out_shape=jax.ShapeDtypeStruct((B, L, N), jnp.float32),
        grid=(1,),
        in_specs=[pl.BlockSpec((B * L, E), lambda i: (0, 0)),
                  pl.BlockSpec((B, N, C), lambda i: (0, 0, 0)),
                  pl.BlockSpec((E, C), lambda i: (0, 0)),
                  pl.BlockSpec((1, C), lambda i: (0, 0))],
        out_specs=pl.BlockSpec((B, L, N), lambda i: (0, 0, 0)),
    )(text2, vis, we_f, b1_f)

    # top-k along N per (b, l) -> per-(b, l) score threshold (XLA glue; sort-like op).
    # Ties at the k-th value may select extra entries vs. the reference index scatter.
    K_neigs = np.rint(N * np.asarray(k_np, dtype=np.float64)).astype(np.int32)  # (B,)
    max_k = int(K_neigs.max())
    if max_k > 0:
        vals = lax.top_k(attn, max_k)[0]
        kidx = jnp.clip(jnp.asarray(K_neigs, jnp.int32) - 1, 0, max_k - 1)
        kth = jnp.take_along_axis(
            vals, jnp.broadcast_to(kidx[:, None, None], (B, L, 1)), axis=-1)
        thr = jnp.where((jnp.asarray(K_neigs) > 0)[:, None, None], kth, jnp.inf)
    else:
        thr = jnp.full((B, L, 1), jnp.inf, jnp.float32)

    # out Linear(E->C) + eval BN scale folded; BN shift stays as (C,1) column add
    s2 = p["bn_gamma"] * lax.rsqrt(p["bn_var"] + BN_EPS)
    b2 = (-p["bn_mean"] * s2 + p["bn_beta"]).reshape(C, 1)
    wo_f = p["out_w"].T * s2[None, :]                                      # (E, C)
    bo_f = (p["out_b"] * s2).reshape(1, C)

    imgT = jnp.swapaxes(vis, 1, 2)   # residual channels-first (smallest activation)

    return pl.pallas_call(
        _make_hgnn_out_kernel(B, L),
        out_shape=jax.ShapeDtypeStruct((B, C, N), jnp.float32),
        grid=(1,),
        in_specs=[pl.BlockSpec((B, L, N), lambda i: (0, 0, 0)),
                  pl.BlockSpec((B, C, N), lambda i: (0, 0, 0)),
                  pl.BlockSpec((B * L, E), lambda i: (0, 0)),
                  pl.BlockSpec((B, L, 1), lambda i: (0, 0, 0)),
                  pl.BlockSpec((E, C), lambda i: (0, 0)),
                  pl.BlockSpec((1, C), lambda i: (0, 0)),
                  pl.BlockSpec((C, 1), lambda i: (0, 0))],
        out_specs=pl.BlockSpec((B, C, N), lambda i: (0, 0, 0)),
    )(attn, imgT, text2, thr, wo_f, bo_f, b2)


# ----------------------------------------------------------------------------
# Decoder weight packing (trace time): compose ConvTranspose2d(k=2,s=2) with conv1's
# up-channel group, and pack conv1/conv2 3x3 weights into big-K matrices over the
# (shift, parity-plane) stacked slab layout.  BN scales folded into weight rows.
# ----------------------------------------------------------------------------
def _dim_tap(par, off):
    p_in = (par + off) % 2
    d = (par + off - p_in) // 2
    return p_in, d


def pack_decoder_weights(dp, Cin):
    wt = dp["transp_w"]                      # (Cin, Cu, 2, 2)  (ConvTranspose2d layout)
    w1 = dp["conv1_w"]                       # (Co, Cu+Cs, 3, 3) on cat([up, skip])
    w2 = dp["conv2_w"]                       # (Co, Co, 3, 3)
    Cu = wt.shape[1]
    Co = w1.shape[0]
    Cs = w1.shape[1] - Cu

    s1 = dp["bn1_gamma"] * lax.rsqrt(dp["bn1_var"] + BN_EPS)
    b1 = -dp["bn1_mean"] * s1 + dp["bn1_beta"]
    s2 = dp["bn2_gamma"] * lax.rsqrt(dp["bn2_var"] + BN_EPS)
    b2 = -dp["bn2_mean"] * s2 + dp["bn2_beta"]

    wt_mat = [wt[:, :, r, s].T for r in range(2) for s in range(2)]   # rho -> (Cu, Cin)
    w1u, w1s = w1[:, :Cu], w1[:, Cu:]
    uidx = {sh: i for i, sh in enumerate(_SHIFTS)}

    w1_rows, w2_rows = [], []
    for r in range(2):
        for s in range(2):
            skip_blk = [[jnp.zeros((Co, Cs), jnp.float32) for _ in range(4)] for _ in range(9)]
            x_blk = [jnp.zeros((Co, Cin), jnp.float32) for _ in range(9)]
            h_blk = [[jnp.zeros((Co, Co), jnp.float32) for _ in range(4)] for _ in range(9)]
            for a in (-1, 0, 1):
                rp, dr = _dim_tap(r, a)
                for b in (-1, 0, 1):
                    sp, dc = _dim_tap(s, b)
                    u = uidx[(dr, dc)]
                    rho_in = 2 * rp + sp
                    x_blk[u] = x_blk[u] + w1u[:, :, a + 1, b + 1] @ wt_mat[rho_in]
                    skip_blk[u][rho_in] = skip_blk[u][rho_in] + w1s[:, :, a + 1, b + 1]
                    h_blk[u][rho_in] = h_blk[u][rho_in] + w2[:, :, a + 1, b + 1]
            cols1 = []
            for u in range(9):
                cols1.extend(skip_blk[u])
            for u in range(9):
                cols1.append(x_blk[u])
            w1_rows.append(jnp.concatenate(cols1, axis=1) * s1[:, None])
            cols2 = []
            for u in range(9):
                cols2.extend(h_blk[u])
            w2_rows.append(jnp.concatenate(cols2, axis=1) * s2[:, None])

    w1p = jnp.concatenate(w1_rows, axis=0).astype(jnp.bfloat16)       # (4Co, 9*4*Cs + 9*Cin)
    w2p = jnp.concatenate(w2_rows, axis=0).astype(jnp.bfloat16)       # (4Co, 9*4*Co)
    b1t = jnp.tile(b1, 4).reshape(4 * Co, 1).astype(jnp.float32)
    b2t = jnp.tile(b2, 4).reshape(4 * Co, 1).astype(jnp.float32)
    return w1p, w2p, b1t, b2t, Cs, Co


# ----------------------------------------------------------------------------
# Fused decoder kernel (per batch), parity-plane space, two big-K matmuls.
# ----------------------------------------------------------------------------
def _make_decoder_kernel(S, Cin, Cs, Co, padl):
    P = S * S
    SK = 4 * Cs
    HK = 4 * Co

    def kernel(x_ref, skip_ref, w1_ref, w2_ref, b1_ref, b2_ref, o_ref,
               x_pad, skip_pad, h1_pad, slab1, slab2):
        q_idx = lax.broadcasted_iota(jnp.int32, (1, P), 1) % S
        col_ok = {0: None, -1: q_idx >= 1, 1: q_idx <= S - 2}

        # Only the halo columns need zeros; interiors are fully rewritten each step.
        # Zeroed every step (cheap) because with a 'parallel' batch axis the scratch
        # is per-core and program_id==0 may never run on a given core.
        for buf, rows in ((x_pad, Cin), (skip_pad, SK), (h1_pad, HK)):
            padw = buf.shape[1]
            buf[:, :padl] = jnp.zeros((rows, padl), buf.dtype)
            buf[:, padl + P:] = jnp.zeros((rows, padw - padl - P), buf.dtype)

        x_pad[:, padl:padl + P] = x_ref[0].astype(jnp.bfloat16)
        skip_pad[:, padl:padl + P] = skip_ref[0]

        def emit_views(src, nrows, slab, base):
            # each unique (stacked-plane, shift) view is sliced exactly once
            for u, (dr, dc) in enumerate(_SHIFTS):
                off = dr * S + dc
                v = src[:, padl + off: padl + off + P]
                m = col_ok[dc]
                if m is not None:                       # column wrap mask before stacking
                    v = jnp.where(m, v, jnp.zeros_like(v))
                slab[base + u * nrows: base + (u + 1) * nrows, :] = v

        # conv1 on cat([transp_conv(x), skip]): transp conv pre-composed into weights
        emit_views(skip_pad, SK, slab1, 0)
        emit_views(x_pad, Cin, slab1, 9 * SK)
        h1 = jnp.dot(w1_ref[...], slab1[...],
                     preferred_element_type=jnp.float32) + b1_ref[...]      # (4Co, P)
        h1 = jnp.where(h1 > 0, h1, LEAKY_SLOPE * h1)
        h1_pad[:, padl:padl + P] = h1.astype(jnp.bfloat16)

        # conv2 3x3 + BN + LeakyReLU (h1 never leaves VMEM)
        emit_views(h1_pad, HK, slab2, 0)
        y = jnp.dot(w2_ref[...], slab2[...],
                    preferred_element_type=jnp.float32) + b2_ref[...]       # (4Co, P)
        o_ref[0] = jnp.where(y > 0, y, LEAKY_SLOPE * y)

    return kernel


def decoder_block(x, skip_vis, dparams, S):
    """x: (B, Cin, S*S) channels-first.  skip_vis: (B, (2S)^2, Cs) channels-last.
    Returns (B, (2S)^2, Cout) channels-last (module interface)."""
    B, Cin, P = x.shape
    assert P == S * S
    Cs_in = skip_vis.shape[-1]

    padl = ((S + 1 + 127) // 128) * 128      # left halo lane-aligned interior writes
    padr = ((S + 1 + 7) // 8) * 8            # right halo only needs >= S+1
    padw = padl + P + padr

    # space-to-depth of the skip connection (interface glue, performed in bf16)
    skipP = jnp.transpose(
        skip_vis.astype(jnp.bfloat16).reshape(B, S, 2, S, 2, Cs_in),
        (0, 2, 4, 5, 1, 3)).reshape(B, 4 * Cs_in, P)

    w1p, w2p, b1t, b2t, Cs, Co = pack_decoder_weights(dparams, Cin)
    assert Cs == Cs_in
    K1 = 9 * 4 * Cs + 9 * Cin
    K2 = 9 * 4 * Co

    kernel = _make_decoder_kernel(S, Cin, Cs, Co, padl)
    planes = pl.pallas_call(
        kernel,
        out_shape=jax.ShapeDtypeStruct((B, 4 * Co, P), jnp.float32),
        grid=(B,),
        in_specs=[pl.BlockSpec((1, Cin, P), lambda b: (b, 0, 0)),
                  pl.BlockSpec((1, 4 * Cs, P), lambda b: (b, 0, 0)),
                  pl.BlockSpec((4 * Co, K1), lambda b: (0, 0)),
                  pl.BlockSpec((4 * Co, K2), lambda b: (0, 0)),
                  pl.BlockSpec((4 * Co, 1), lambda b: (0, 0)),
                  pl.BlockSpec((4 * Co, 1), lambda b: (0, 0))],
        out_specs=pl.BlockSpec((1, 4 * Co, P), lambda b: (b, 0, 0)),
        scratch_shapes=[pltpu.VMEM((Cin, padw), jnp.bfloat16),
                        pltpu.VMEM((4 * Cs, padw), jnp.bfloat16),
                        pltpu.VMEM((4 * Co, padw), jnp.bfloat16),
                        pltpu.VMEM((K1, P), jnp.bfloat16),
                        pltpu.VMEM((K2, P), jnp.bfloat16)],
        compiler_params=pltpu.CompilerParams(dimension_semantics=("parallel",)),
    )(x, skipP, w1p, w2p, b1t, b2t)

    # depth-to-space + channels-last: (B, r, s, Co, p, q) -> (B, (2S)^2, Co)
    out = jnp.transpose(planes.reshape(B, 2, 2, Co, S, S), (0, 4, 1, 5, 2, 3))
    return out.reshape(B, (2 * S) * (2 * S), Co)


# ----------------------------------------------------------------------------
# GuideDecoder forward
# ----------------------------------------------------------------------------
def guide_decoder_forward(vis, skip_vis, txt, k, params, spatial_size):
    if txt is not None:
        x = hgnn_layer(vis, txt, k, params["hgnn"])            # (B, C, N) channels-first
    else:
        x = jnp.swapaxes(vis, 1, 2)
    return decoder_block(x, skip_vis, params["decoder"], spatial_size)


# ----------------------------------------------------------------------------
# Deterministic synthetic parameters
# ----------------------------------------------------------------------------
def init_params(key, in_ch, out_ch, embed_dim):
    keys = jax.random.split(key, 16)

    def nrm(k, shape, scale=0.1):
        return scale * jax.random.normal(k, shape, jnp.float32)

    hgnn = dict(
        emb_conv_w=nrm(keys[0], (in_ch, embed_dim)),   # Conv1d(E->C, k=1) weight (C, E)
        emb_conv_b=nrm(keys[1], (in_ch,)),
        emb_bn_gamma=1.0 + nrm(keys[2], (in_ch,), 0.05),
        emb_bn_beta=nrm(keys[3], (in_ch,), 0.05),
        emb_bn_mean=nrm(keys[4], (in_ch,), 0.05),
        emb_bn_var=1.0 + jnp.abs(nrm(keys[5], (in_ch,), 0.05)),
        out_w=nrm(keys[6], (in_ch, embed_dim)),        # Linear(E->C) weight (C, E)
        out_b=nrm(keys[7], (in_ch,)),
        bn_gamma=1.0 + nrm(keys[8], (in_ch,), 0.05),
        bn_beta=nrm(keys[9], (in_ch,), 0.05),
        bn_mean=nrm(keys[10], (in_ch,), 0.05),
        bn_var=1.0 + jnp.abs(nrm(keys[11], (in_ch,), 0.05)),
    )
    dk = jax.random.split(keys[15], 11)
    decoder = dict(
        transp_w=nrm(dk[0], (in_ch, out_ch, 2, 2)),            # ConvTranspose2d (Cin, Cout, 2, 2)
        conv1_w=nrm(dk[1], (out_ch, 2 * out_ch, 3, 3)),        # conv on cat([up, skip])
        bn1_gamma=1.0 + nrm(dk[2], (out_ch,), 0.05),
        bn1_beta=nrm(dk[3], (out_ch,), 0.05),
        bn1_mean=nrm(dk[4], (out_ch,), 0.05),
        bn1_var=1.0 + jnp.abs(nrm(dk[5], (out_ch,), 0.05)),
        conv2_w=nrm(dk[6], (out_ch, out_ch, 3, 3)),
        bn2_gamma=1.0 + nrm(dk[7], (out_ch,), 0.05),
        bn2_beta=nrm(dk[8], (out_ch,), 0.05),
        bn2_mean=nrm(dk[9], (out_ch,), 0.05),
        bn2_var=1.0 + jnp.abs(nrm(dk[10], (out_ch,), 0.05)),
    )
    return {"hgnn": hgnn, "decoder": decoder}


if __name__ == "__main__":
    B, in_ch, out_ch = 2, 8, 4
    spatial_size = 16
    L, embed_dim = 8, 32
    N = spatial_size * spatial_size

    key = jax.random.PRNGKey(0)
    k1, k2, k3, kp = jax.random.split(key, 4)
    vis = jax.random.normal(k1, (B, N, in_ch), jnp.float32)
    skip_vis = jax.random.normal(k2, (B, (2 * spatial_size) ** 2, out_ch), jnp.float32)
    txt = jax.random.normal(k3, (B, L, embed_dim), jnp.float32)
    k = np.array([0.10, 0.05], dtype=np.float32)   # per-batch top-k fraction (as in reference)

    params = init_params(kp, in_ch, out_ch, embed_dim)
    out = guide_decoder_forward(vis, skip_vis, txt, k, params, spatial_size)
    out = jax.block_until_ready(out)
    assert out.shape == (B, (2 * spatial_size) ** 2, out_ch)
    assert bool(jnp.all(jnp.isfinite(out)))
    print("KERNEL_OK")
</pallas_src>

<mosaic_0001>
module attributes {stable_mosaic.version = 11 : i64} {
  func.func @kernel(%arg0: i32, %arg1: memref<16x32xf32, #tpu.memory_space<vmem>>, %arg2: memref<2x256x8xf32, #tpu.memory_space<vmem>>, %arg3: memref<32x8xf32, #tpu.memory_space<vmem>>, %arg4: memref<1x8xf32, #tpu.memory_space<vmem>>, %arg5: memref<2x8x256xf32, #tpu.memory_space<vmem>>) attributes {dimension_semantics = [#tpu.dimension_semantics<arbitrary>], iteration_bounds = array<i64: 1>, scalar_prefetch = 0 : i64, scratch_operands = 0 : i64, tpu.core_type = #tpu.core_type<tc>, window_params = [{pipeline_mode = #tpu.pipeline_mode<synchronous>, transform_indices = @transform_0, window_bounds = array<i64: 16, 32>}, {pipeline_mode = #tpu.pipeline_mode<synchronous>, transform_indices = @transform_1, window_bounds = array<i64: 2, 256, 8>}, {pipeline_mode = #tpu.pipeline_mode<synchronous>, transform_indices = @transform_2, window_bounds = array<i64: 32, 8>}, {pipeline_mode = #tpu.pipeline_mode<synchronous>, transform_indices = @transform_3, window_bounds = array<i64: 1, 8>}, {pipeline_mode = #tpu.pipeline_mode<synchronous>, transform_indices = @transform_4, window_bounds = array<i64: 2, 8, 256>}]} {
    %c0 = arith.constant 0 : index
    %c0_0 = arith.constant 0 : index
    %0 = vector.load %arg1[%c0, %c0_0] : memref<16x32xf32, #tpu.memory_space<vmem>>, vector<16x32xf32>
    %c0_1 = arith.constant 0 : index
    %c0_2 = arith.constant 0 : index
    %1 = vector.load %arg3[%c0_1, %c0_2] : memref<32x8xf32, #tpu.memory_space<vmem>>, vector<32x8xf32>
    %cst = arith.constant dense<0.000000e+00> : vector<16x8xf32>
    %2 = tpu.matmul %0, %1, %cst {dimension_numbers = #tpu.dot_dimension_numbers<[1], [0], [0], [1], [0, 0, 1, 1], [], []>} : vector<16x32xf32>, vector<32x8xf32>, vector<16x8xf32> -> vector<16x8xf32>
    %c0_3 = arith.constant 0 : index
    %c0_4 = arith.constant 0 : index
    %3 = vector.load %arg4[%c0_3, %c0_4] : memref<1x8xf32, #tpu.memory_space<vmem>>, vector<1x8xf32>
    %4 = vector.broadcast %3 : vector<1x8xf32> to vector<16x8xf32>
    %5 = arith.addf %2, %4 : vector<16x8xf32>
    %cst_5 = arith.constant 0.000000e+00 : f32
    %6 = vector.broadcast %cst_5 : f32 to vector<16x8xf32>
    %7 = arith.maximumf %5, %6 : vector<16x8xf32>
    %8 = arith.truncf %7 : vector<16x8xf32> to vector<16x8xbf16>
    %9 = vector.extract_strided_slice %8 {offsets = [0, 0], sizes = [8, 8], strides = [1, 1]} : vector<16x8xbf16> to vector<8x8xbf16>
    %c0_6 = arith.constant 0 : index
    %c0_7 = arith.constant 0 : index
    %c0_8 = arith.constant 0 : index
    %10 = vector.load %arg2[%c0_6, %c0_7, %c0_8] : memref<2x256x8xf32, #tpu.memory_space<vmem>>, vector<1x256x8xf32>
    %11 = vector.shape_cast %10 : vector<1x256x8xf32> to vector<256x8xf32>
    %12 = arith.truncf %11 : vector<256x8xf32> to vector<256x8xbf16>
    %cst_9 = arith.constant dense<0.000000e+00> : vector<8x256xf32>
    %13 = tpu.matmul %9, %12, %cst_9 {dimension_numbers = #tpu.dot_dimension_numbers<[1], [1], [0], [0], [0, 0, 1, 0], [], []>} : vector<8x8xbf16>, vector<256x8xbf16>, vector<8x256xf32> -> vector<8x256xf32>
    %c0_10 = arith.constant 0 : index
    %c0_11 = arith.constant 0 : index
    %c0_12 = arith.constant 0 : index
    %14 = vector.load %arg5[%c0_10, %c0_11, %c0_12] : memref<2x8x256xf32, #tpu.memory_space<vmem>>, vector<1x8x256xf32>
    %15 = vector.shape_cast %14 : vector<1x8x256xf32> to vector<8x256xf32>
    %16 = vector.shape_cast %13 : vector<8x256xf32> to vector<1x8x256xf32>
    tpu.vector_store %arg5[%c0_10, %c0_11, %c0_12], %16 {strides = array<i32>} : memref<2x8x256xf32, #tpu.memory_space<vmem>>, vector<1x8x256xf32>,
    %17 = vector.extract_strided_slice %8 {offsets = [8, 0], sizes = [8, 8], strides = [1, 1]} : vector<16x8xbf16> to vector<8x8xbf16>
    %c1 = arith.constant 1 : index
    %c0_13 = arith.constant 0 : index
    %c0_14 = arith.constant 0 : index
    %18 = vector.load %arg2[%c1, %c0_13, %c0_14] : memref<2x256x8xf32, #tpu.memory_space<vmem>>, vector<1x256x8xf32>
    %19 = vector.shape_cast %18 : vector<1x256x8xf32> to vector<256x8xf32>
    %20 = arith.truncf %19 : vector<256x8xf32> to vector<256x8xbf16>
    %cst_15 = arith.constant dense<0.000000e+00> : vector<8x256xf32>
    %21 = tpu.matmul %17, %20, %cst_15 {dimension_numbers = #tpu.dot_dimension_numbers<[1], [1], [0], [0], [0, 0, 1, 0], [], []>} : vector<8x8xbf16>, vector<256x8xbf16>, vector<8x256xf32> -> vector<8x256xf32>
    %c1_16 = arith.constant 1 : index
    %c0_17 = arith.constant 0 : index
    %c0_18 = arith.constant 0 : index
    %22 = vector.load %arg5[%c1_16, %c0_17, %c0_18] : memref<2x8x256xf32, #tpu.memory_space<vmem>>, vector<1x8x256xf32>
    %23 = vector.shape_cast %22 : vector<1x8x256xf32> to vector<8x256xf32>
    %24 = vector.shape_cast %21 : vector<8x256xf32> to vector<1x8x256xf32>
    tpu.vector_store %arg5[%c1_16, %c0_17, %c0_18], %24 {strides = array<i32>} : memref<2x8x256xf32, #tpu.memory_space<vmem>>, vector<1x8x256xf32>,
    return
  }
  func.func @transform_0(%arg0: i32) -> (i32, i32) {
    %c0_i32 = arith.constant 0 : i32
    %c0_i32_0 = arith.constant 0 : i32
    %c0_i32_1 = arith.constant 0 : i32
    return %c0_i32, %c0_i32_0 : i32, i32
  }
  func.func @transform_1(%arg0: i32) -> (i32, i32, i32) {
    %c0_i32 = arith.constant 0 : i32
    %c0_i32_0 = arith.constant 0 : i32
    %c0_i32_1 = arith.constant 0 : i32
    %c0_i32_2 = arith.constant 0 : i32
    return %c0_i32, %c0_i32_0, %c0_i32_1 : i32, i32, i32
  }
  func.func @transform_2(%arg0: i32) -> (i32, i32) {
    %c0_i32 = arith.constant 0 : i32
    %c0_i32_0 = arith.constant 0 : i32
    %c0_i32_1 = arith.constant 0 : i32
    return %c0_i32, %c0_i32_0 : i32, i32
  }
  func.func @transform_3(%arg0: i32) -> (i32, i32) {
    %c0_i32 = arith.constant 0 : i32
    %c0_i32_0 = arith.constant 0 : i32
    %c0_i32_1 = arith.constant 0 : i32
    return %c0_i32, %c0_i32_0 : i32, i32
  }
  func.func @transform_4(%arg0: i32) -> (i32, i32, i32) {
    %c0_i32 = arith.constant 0 : i32
    %c0_i32_0 = arith.constant 0 : i32
    %c0_i32_1 = arith.constant 0 : i32
    %c0_i32_2 = arith.constant 0 : i32
    return %c0_i32, %c0_i32_0, %c0_i32_1 : i32, i32, i32
  }
}

</mosaic_0001>

<bundles_post_ra>
// kernel: tpu_custom_call.1
= control target key start
LH: loop header
LB: loop body
LE: loop exit
PB: predicated region body
PF: predicated region fallthrough
CT: control target
= control target key end

     0   :  { %vm32_vm0 = vcmask 261120   ;;  %vm165_vm1 = vcmask 64512   ;;  %s854_s0 = inlined_call_operand.vmem [shape: f32[16,32], index: 0, kind: input, shape index: {}]   ;;  %s855_s1 = inlined_call_operand.vmem [shape: f32[2,256,8], index: 1, kind: input, shape index: {}]   ;;  %s856_s2 = inlined_call_operand.vmem [shape: f32[32,8], index: 2, kind: input, shape index: {}]   ;;  %s857_s3 = inlined_call_operand.vmem [shape: f32[1,8], index: 3, kind: input, shape index: {}]   ;;  %s858_s4 = inlined_call_operand.hbm [shape: f32[2,8,256], index: 4, kind: output, shape index: {}]  }
   0x1   :  { %v21_v0 = vld [vmem:[%s856_s2] sm:$0xff]  ;;  %v22_v1 = vld [vmem:[%s856_s2 + $0x8] sm:$0xff]  ;;  %v23_v2 = vld [vmem:[%s856_s2 + $0x10] sm:$0xff] }
   0x2   :  { %v512_v3 = vpack.c.bf16 %v22_v1, %v21_v0  ;;  %v24_v4 = vld [vmem:[%s856_s2 + $0x18] sm:$0xff]  ;;  %v19_v5 = vld [vmem:[%s854_s0] sm:$0xff]  ;;  %v134_v8 = vld [vmem:[%s855_s1 + $0x88] sm:$0xff] }
   0x3   :  { %v516_v6 = vpack.c.bf16 %v24_v4, %v23_v2  ;;  %509 = vmatprep.mubr.msk.f32.mxu0 %vm32_vm0, %v19_v5  ;;  %v133_v7 = vld [vmem:[%s855_s1 + $0x80] sm:$0xff]  ;;  %v118_v11 = vld [vmem:[%s855_s1 + $0x8] sm:$0xff]  ;;  %v135_v15 = vld [vmem:[%s855_s1 + $0x90] sm:$0xff] }
   0x4   :  { %v117_v9 = vld [vmem:[%s855_s1] sm:$0xff]  ;;  %513 = vmatprep.subr.bf16.mxu0 %v512_v3  ;;  %v157_v10 = vpack.c.bf16 %v134_v8, %v133_v7  ;;  %v443_v13 = vld [vmem:[%s855_s1 + $0x188] sm:$0xff]  ;;  %v136_v17 = vld [vmem:[%s855_s1 + $0x98] sm:$0xff] }
   0x5   :  { %v442_v12 = vld [vmem:[%s855_s1 + $0x180] sm:$0xff]  ;;  %515 = vmatpush3.bf16.msra.mxu0 %v512_v3  ;;  %v149_v14 = vpack.c.bf16 %v118_v11, %v117_v9  ;;  %v119_v18 = vld [vmem:[%s855_s1 + $0x10] sm:$0xff]  ;;  %v120_v19 = vld [vmem:[%s855_s1 + $0x18] sm:$0xff]  ;;  %v158_v21 = vpack.c.bf16 %v136_v17, %v135_v15 }
   0x6   :  { %517 = vmatprep.subr.bf16.mxu0 %v516_v6  ;;  %520 = vmatprep.subr.msk.bf16.mxu1 %vm165_vm1, %v157_v10  ;;  %v301_v16 = vpack.c.bf16 %v443_v13, %v442_v12  ;;  %v426_v22 = vld [vmem:[%s855_s1 + $0x100] sm:$0xff]  ;;  %v427_v23 = vld [vmem:[%s855_s1 + $0x108] sm:$0xff]  ;;  %v150_v25 = vpack.c.bf16 %v120_v19, %v119_v18  ;;  %v444_v29 = vld [vmem:[%s855_s1 + $0x190] sm:$0xff] }
   0x7   :  { %v170_v20 = vsel %vm165_vm1, %v149_v14, 0  ;;  %v20_v24 = vld [vmem:[%s854_s0 + $0x8] sm:$0xff]  ;;  %v137_v26 = vld [vmem:[%s855_s1 + $0xa0] sm:$0xff]  ;;  %v293_v28 = vpack.c.bf16 %v427_v23, %v426_v22  ;;  %v445_v30 = vld [vmem:[%s855_s1 + $0x198] sm:$0xff] }
   0x8   :  { %466 = vmatpush3.bf16.xpose.msra.mxu1 %v170_v20  ;;  %v138_v27 = vld [vmem:[%s855_s1 + $0xa8] sm:$0xff]  ;;  %v173_v31 = vsel %vm165_vm1, %v150_v25, 0  ;;  %v121_v33 = vld [vmem:[%s855_s1 + $0x20] sm:$0xff]  ;;  %v302_v36 = vpack.c.bf16 %v445_v30, %v444_v29  ;;  %v428_v37 = vld [vmem:[%s855_s1 + $0x110] sm:$0xff] }
   0x9   :  { %519 = vmatpush3.bf16.msra.mxu0 %v516_v6  ;;  %521 = vmatprep.subr.msk.bf16.mxu1 %vm165_vm1, %v158_v21  ;;  %v159_v32 = vpack.c.bf16 %v138_v27, %v137_v26  ;;  %v122_v34 = vld [vmem:[%s855_s1 + $0x28] sm:$0xff]  ;;  %v315_v35 = vsel %vm165_vm1, %v293_v28, 0  ;;  %v429_v38 = vld [vmem:[%s855_s1 + $0x118] sm:$0xff]  ;;  %v139_v40 = vld [vmem:[%s855_s1 + $0xb0] sm:$0xff] }
   0xa   :  { %528 = vmatprep.subr.msk.bf16.mxu0 %vm165_vm1, %v301_v16  ;;  %v151_v39 = vpack.c.bf16 %v122_v34, %v121_v33  ;;  %v140_v41 = vld [vmem:[%s855_s1 + $0xb8] sm:$0xff]  ;;  %v294_v42 = vpack.c.bf16 %v429_v38, %v428_v37  ;;  %v446_v43 = vld [vmem:[%s855_s1 + $0x1a0] sm:$0xff]  ;;  %v447_v44 = vld [vmem:[%s855_s1 + $0x1a8] sm:$0xff] }
   0xb   :  { %v160_v46 = vpack.c.bf16 %v140_v41, %v139_v40 }
   0xc   :  { %510 = vmatmul.mubr.msk.f32.vlgmr.msra.gmra.mrb[0].mxu0 %vm32_vm0, %v20_v24  ;;  %v176_v45 = vsel %vm165_vm1, %v151_v39, 0 }
  0x10   :  { %468 = vmatpush3.bf16.xpose.msra.mxu1 %v173_v31 }
  0x11   :  { %522 = vmatprep.subr.msk.bf16.mxu1 %vm165_vm1, %v159_v32 }
  0x12   :  { %484 = vmatpush3.bf16.xpose.msra.mxu0 %v315_v35 }
  0x13   :  { %529 = vmatprep.subr.msk.bf16.mxu0 %vm165_vm1, %v302_v36 }
  0x14   :  { %9 = vsyncpa [#allocation3], 0  ;;  %v123_v47 = vld [vmem:[%s855_s1 + $0x30] sm:$0xff]  ;;  %v124_v48 = vld [vmem:[%s855_s1 + $0x38] sm:$0xff]  ;;  %v318_v49 = vsel %vm165_vm1, %v294_v42, 0  ;;  %v303_v50 = vpack.c.bf16 %v447_v44, %v446_v43 }
  0x15   :  { %v430_v51 = vld [vmem:[%s855_s1 + $0x120] sm:$0xff]  ;;  %v431_v52 = vld [vmem:[%s855_s1 + $0x128] sm:$0xff]  ;;  %v152_v53 = vpack.c.bf16 %v124_v48, %v123_v47  ;;  %v448_v57 = vld [vmem:[%s855_s1 + $0x1b0] sm:$0xff] }
  0x16   :  { %v141_v54 = vld [vmem:[%s855_s1 + $0xc0] sm:$0xff]  ;;  %v142_v55 = vld [vmem:[%s855_s1 + $0xc8] sm:$0xff]  ;;  %v295_v56 = vpack.c.bf16 %v431_v52, %v430_v51  ;;  %v449_v58 = vld [vmem:[%s855_s1 + $0x1b8] sm:$0xff] }
  0x17   :  { %v179_v59 = vsel %vm165_vm1, %v152_v53, 0  ;;  %v161_v60 = vpack.c.bf16 %v142_v55, %v141_v54  ;;  %v125_v61 = vld [vmem:[%s855_s1 + $0x40] sm:$0xff]  ;;  %v126_v62 = vld [vmem:[%s855_s1 + $0x48] sm:$0xff]  ;;  %v304_v0 = vpack.c.bf16 %v449_v58, %v448_v57  ;;  %v432_v1 = vld [vmem:[%s855_s1 + $0x130] sm:$0xff] }
  0x18   :  { %470 = vmatpush3.bf16.xpose.msra.mxu1 %v176_v45  ;;  %v321_v63 = vsel %vm165_vm1, %v295_v56, 0  ;;  %v433_v2 = vld [vmem:[%s855_s1 + $0x138] sm:$0xff]  ;;  %v153_v3 = vpack.c.bf16 %v126_v62, %v125_v61  ;;  %v143_v4 = vld [vmem:[%s855_s1 + $0xd0] sm:$0xff]  ;;  %v450_v7 = vld [vmem:[%s855_s1 + $0x1c0] sm:$0xff] }
  0x19   :  { %523 = vmatprep.subr.msk.bf16.mxu1 %vm165_vm1, %v160_v46  ;;  %v144_v5 = vld [vmem:[%s855_s1 + $0xd8] sm:$0xff]  ;;  %v296_v6 = vpack.c.bf16 %v433_v2, %v432_v1  ;;  %v451_v8 = vld [vmem:[%s855_s1 + $0x1c8] sm:$0xff]  ;;  %v127_v11 = vld [vmem:[%s855_s1 + $0x50] sm:$0xff] }
  0x1a   :  { %486 = vmatpush3.bf16.xpose.msra.mxu0 %v318_v49  ;;  %v182_v9 = vsel %vm165_vm1, %v153_v3, 0  ;;  %v162_v10 = vpack.c.bf16 %v144_v5, %v143_v4  ;;  %v128_v12 = vld [vmem:[%s855_s1 + $0x58] sm:$0xff]  ;;  %v305_v14 = vpack.c.bf16 %v451_v8, %v450_v7  ;;  %v434_v15 = vld [vmem:[%s855_s1 + $0x140] sm:$0xff]  ;;  %v435_v16 = vld [vmem:[%s855_s1 + $0x148] sm:$0xff] }
  0x1b   :  { %530 = vmatprep.subr.msk.bf16.mxu0 %vm165_vm1, %v303_v50  ;;  %v324_v13 = vsel %vm165_vm1, %v296_v6, 0  ;;  %v154_v17 = vpack.c.bf16 %v128_v12, %v127_v11  ;;  %v145_v18 = vld [vmem:[%s855_s1 + $0xe0] sm:$0xff]  ;;  %v146_v19 = vld [vmem:[%s855_s1 + $0xe8] sm:$0xff]  ;;  %v297_v20 = vpack.c.bf16 %v435_v16, %v434_v15  ;;  %v452_v21 = vld [vmem:[%s855_s1 + $0x1d0] sm:$0xff] }
  0x1c   :  { %v453_v22 = vld [vmem:[%s855_s1 + $0x1d8] sm:$0xff]  ;;  %v163_v24 = vpack.c.bf16 %v146_v19, %v145_v18  ;;  %v129_v25 = vld [vmem:[%s855_s1 + $0x60] sm:$0xff]  ;;  %v130_v26 = vld [vmem:[%s855_s1 + $0x68] sm:$0xff] }
  0x1d   :  { %v185_v23 = vsel %vm165_vm1, %v154_v17, 0  ;;  %v327_v27 = vsel %vm165_vm1, %v297_v20, 0  ;;  %v306_v28 = vpack.c.bf16 %v453_v22, %v452_v21  ;;  %v436_v29 = vld [vmem:[%s855_s1 + $0x150] sm:$0xff]  ;;  %v437_v30 = vld [vmem:[%s855_s1 + $0x158] sm:$0xff]  ;;  %v155_v31 = vpack.c.bf16 %v130_v26, %v129_v25  ;;  %v454_v33 = vld [vmem:[%s855_s1 + $0x1e0] sm:$0xff] }
  0x1e   :  { %v298_v32 = vpack.c.bf16 %v437_v30, %v436_v29  ;;  %v455_v34 = vld [vmem:[%s855_s1 + $0x1e8] sm:$0xff]  ;;  %v438_v38 = vld [vmem:[%s855_s1 + $0x160] sm:$0xff]  ;;  %v147_v42 = vld [vmem:[%s855_s1 + $0xf0] sm:$0xff] }
  0x1f   :  { %v188_v35 = vsel %vm165_vm1, %v155_v31, 0  ;;  %v307_v37 = vpack.c.bf16 %v455_v34, %v454_v33  ;;  %v439_v39 = vld [vmem:[%s855_s1 + $0x168] sm:$0xff]  ;;  %v148_v43 = vld [vmem:[%s855_s1 + $0xf8] sm:$0xff]  ;;  %v131_v44 = vld [vmem:[%s855_s1 + $0x70] sm:$0xff] }
  0x20   :  { %472 = vmatpush3.bf16.xpose.msra.mxu1 %v179_v59  ;;  %v330_v36 = vsel %vm165_vm1, %v298_v32, 0  ;;  %v299_v40 = vpack.c.bf16 %v439_v39, %v438_v38  ;;  %v164_v45 = vpack.c.bf16 %v148_v43, %v147_v42  ;;  %v132_v46 = vld [vmem:[%s855_s1 + $0x78] sm:$0xff]  ;;  %v456_v48 = vld [vmem:[%s855_s1 + $0x1f0] sm:$0xff]  ;;  %v422_v56 = vld [vmem:[%s857_s3] ss:$0 sm:$0xff] }
  0x21   :  { %524 = vmatprep.subr.msk.bf16.mxu1 %vm165_vm1, %v161_v60  ;;  %v156_v47 = vpack.c.bf16 %v132_v46, %v131_v44  ;;  %v457_v49 = vld [vmem:[%s855_s1 + $0x1f8] sm:$0xff]  ;;  %v440_v51 = vld [vmem:[%s855_s1 + $0x170] sm:$0xff] }
  0x22   :  { %488 = vmatpush3.bf16.xpose.msra.mxu0 %v321_v63  ;;  %v333_v41 = vsel %vm165_vm1, %v299_v40, 0  ;;  %v308_v50 = vpack.c.bf16 %v457_v49, %v456_v48  ;;  %v441_v52 = vld [vmem:[%s855_s1 + $0x178] sm:$0xff]  ;;  %s563_s1 = smov [#allocation2]  }
  0x23   :  { %531 = vmatprep.subr.msk.bf16.mxu0 %vm165_vm1, %v304_v0  ;;  %v191_v53 = vsel %vm165_vm1, %v156_v47, 0  ;;  %v300_v54 = vpack.c.bf16 %v441_v52, %v440_v51  ;;  %s411_s18 = sshll.u32 %s563_s1, 4  ;;  %s412_s18 = int_to_ptr.vmem [resolvable:$true] %s411_s18 }
  0x24   :  { %s539_s3 = scalar_lea.vmem %s412_s18, 512  ;;  %p544_p1 = scmp.lt.s32.totalorder %s412_s18, %s412_s18 }
  0x25   :  { %v336_v55 = vsel %vm165_vm1, %v300_v54, 0  ;;  %p540_p0 = scmp.ne.s32.totalorder %s412_s18, %s539_s3  ;;  %p545_p2 = scmp.lt.s32.totalorder %s539_s3, %s539_s3 }
  0x27   :  { %p546_p3 = por %p545_p2, %p544_p1 }
  0x28   :  { %474 = vmatpush3.bf16.xpose.msra.mxu1 %v182_v9 }
  0x29   :  { %525 = vmatprep.subr.msk.bf16.mxu1 %vm165_vm1, %v162_v10  ;;  %p547_p4 = pnand %p546_p3, %p540_p0 }
  0x2a   :  { %490 = vmatpush3.bf16.xpose.msra.mxu0 %v324_v13 }
  0x2b   :  { %532 = vmatprep.subr.msk.bf16.mxu0 %vm165_vm1, %v305_v14 }
  0x30   :  { %476 = vmatpush3.bf16.xpose.msra.mxu1 %v185_v23 }
  0x31   :  { %526 = vmatprep.subr.msk.bf16.mxu1 %vm165_vm1, %v163_v24 }
  0x32   :  { %492 = vmatpush3.bf16.xpose.msra.mxu0 %v327_v27 }
  0x33   :  { %533 = vmatprep.subr.msk.bf16.mxu0 %vm165_vm1, %v306_v28 }
  0x38   :  { %478 = vmatpush3.bf16.xpose.msra.mxu1 %v188_v35 }
  0x39   :  { %527 = vmatprep.subr.msk.bf16.mxu1 %vm165_vm1, %v164_v45 }
  0x3a   :  { %494 = vmatpush3.bf16.xpose.msra.mxu0 %v330_v36 }
  0x3b   :  { %534 = vmatprep.subr.msk.bf16.mxu0 %vm165_vm1, %v307_v37 }
  0x40   :  { %480 = vmatpush3.bf16.xpose.msra.mxu1 %v191_v53 }
  0x42   :  { %496 = vmatpush3.bf16.xpose.msra.mxu0 %v333_v41 }
  0x43   :  { %535 = vmatprep.subr.msk.bf16.mxu0 %vm165_vm1, %v308_v50 }
  0x4a   :  { %498 = vmatpush3.bf16.xpose.msra.mxu0 %v336_v55 }
  0xdf   :  { %v511_v57 = vpop.f32.mrb[0].mxu0 }
  0xe0   :  { %v111_v58 = vadd.f32 %v511_v57, %v422_v56  ;;  %v105_v59 = vpop.f32.mrb[1].mxu0 }
  0xe1   :  { %v106_v60 = vadd.f32 %v422_v56, %v105_v59 }
  0xe2   :  { %v115_v61 = vmax.f32 %v111_v58, 0.0 }
  0xe3   :  { %v114_v62 = vmax.f32 %v106_v60, 0.0 }
  0xe5   :  { %v116_v63 = vpack.c.bf16 %v115_v61, %v114_v62 }
  0xe7   :  { %481 = vmatprep.mubr.msk.bf16.mxu1 %vm165_vm1, %v116_v63  ;;  %v310_v0 = vrot.slane %v116_v63, 4 }
  0xe8   :  { %482 = vmatmul.mubr.msk.bf16.vlgmr.msra.gmra.mrb[0].mxu1 %vm165_vm1, %v116_v63 }
  0xe9   :  { %499 = vmatprep.mubr.msk.bf16.mxu0 %vm165_vm1, %v310_v0 }
  0xea   :  { %500 = vmatmul.mubr.msk.bf16.vlgmr.msra.gmra.mrb[4].mxu0 %vm165_vm1, %v310_v0 }
 0x1bb   :  { %v251_v1 = vpop.f32.mrb[0].mxu1 }
 0x1bc   :  { %258 = vst [vmem:[#allocation2] sm:$0xff] %v251_v1  ;;  %v253_v2 = vpop.f32.mrb[1].mxu1 }
 0x1bd   :  { %259 = vst [vmem:[#allocation2 + $0x8] sm:$0xff] %v253_v2  ;;  %v255_v3 = vpop.f32.mrb[2].mxu1  ;;  %v396_v4 = vpop.f32.mrb[4].mxu0 }
 0x1be   :  { %404 = vst [vmem:[#allocation2 + $0x10] sm:$0xff] %v396_v4  ;;  %v256_v5 = vpop.f32.mrb[3].mxu1  ;;  %v398_v6 = vpop.f32.mrb[5].mxu0 }
 0x1bf   :  { %405 = vst [vmem:[#allocation2 + $0x18] sm:$0xff] %v398_v6  ;;  %v400_v7 = vpop.f32.mrb[6].mxu0 }
 0x1c0   :  { %v401_v8 = vpop.f32.mrb[7].mxu0 }
 0x1c1   :  { %550 = shalt.err (!%p547_p4)
}
 0x1c2   :  { %s551_s21 = scalar_lea.hbm %s858_s4, 512 }
 0x1c3   :  { %p552_p5 = scmp.ne.s32.totalorder %s858_s4, %s551_s21  ;;  %p555_p6 = scmp.lt.u32.totalorder %s551_s21, %s858_s4 }
 0x1c5   :  { %p557_p7 = pnand %p555_p6, %p552_p5 }
 0x1c7   :  { %560 = shalt.err (!%p557_p7)
}
 0x1c8   :  { %s564_s26 = smov 256   ;;  %s565_s27 = smov 16  }
 0x1c9   :  { %417 = dma.vmem_to_hbm [thread:$0]  %s412_s18, 512, %s858_s4, [#allocation3], %s564_s26, %s564_s26, %s565_s27  }
 0x1ca   :  { %561 = dma.done.wait [#allocation3], 512  }
 0x1cb   :  { %562 = vsyncadd [#allocation3], 4294966784 }
 0x1cc   :  { %421 = vsyncpa [#allocation3], 1 }

</bundles_post_ra>
